<compile_context>
chip_gen: v7x
topology: tpu7x:2x2x1
jax: 0.10.0
libtpu: 0.0.40
codegen_flags: <defaults>
</compile_context>

<pallas_src>
import jax
import jax.numpy as jnp
import numpy as np
from jax.experimental import pallas as pl
from jax.experimental.pallas import tpu as pltpu

_LANE = 128
_VMEM_BUDGET = 40 * 1024 * 1024      # tile-selection budget (fits v7x 64 MiB)


def _round_up(x, m):
    return (x + m - 1) // m * m


def _pick_tile(n, candidates, prefer_two_blocks=False):
    for c in candidates:
        if n % c == 0 and (not prefer_two_blocks or n // c >= 2):
            return c
    return n


def _vmem_limit(footprint):
    # Raise the scoped limit when tiles are big, but never request v7x's whole
    # 64 MiB; leave headroom for compiler-internal scratch.
    return int(min(48 * 2**20, max(32 * 2**20, footprint + 8 * 2**20)))


# ------------------------------- kernels ------------------------------------


def proj_kernel(x_ref, w_ref, xw_ref):
    # xw = x @ w. Cast both operands to bf16 in-kernel (cheap VPU work,
    # guarantees single-pass bf16 MXU issue, no wrapper-side cast traffic).
    x = x_ref[...].astype(jnp.bfloat16)
    w = w_ref[...].astype(jnp.bfloat16)
    xw_ref[...] = jnp.dot(
        x, w, preferred_element_type=jnp.float32
    ).astype(xw_ref.dtype)


def make_agg_kernel(tile_k, xw_resident):
    def kernel(adj_ref, xw_ref, o_ref):
        # adj_ref: [TM, TK] adjacency tile (native dtype, cast here)
        # xw_ref : [N, Dout] resident  OR  [TK, Dout] streamed (bf16)
        # o_ref  : [TM, Dout] f32 output tile, VMEM-resident across the k axis
        k = pl.program_id(1)

        @pl.when(k == 0)
        def _():
            o_ref[...] = jnp.zeros_like(o_ref)

        a = adj_ref[...].astype(jnp.bfloat16)          # in-kernel cast
        if xw_resident:
            start = pl.multiple_of(k * tile_k, tile_k)
            xw = xw_ref[pl.ds(start, tile_k), :]
        else:
            xw = xw_ref[...]
        # Accumulate directly into the revisited output block (no scratch).
        o_ref[...] += jnp.dot(a, xw, preferred_element_type=jnp.float32)

        @pl.when(k == pl.num_programs(1) - 1)
        def _():
            o_ref[...] = jnp.maximum(o_ref[...], 0.0)

    return kernel


# ------------------------------- wrapper ------------------------------------


def graph_conv_sparse(inputs, weight, adj):
    """out = relu(adj @ (inputs @ weight)); bf16 MXU streaming, f32 accumulate."""
    N, Din = inputs.shape
    Dout = weight.shape[1]
    assert adj.shape == (N, N)

    Np = _round_up(N, _LANE)
    Dout_p = _round_up(Dout, _LANE)

    if Dout_p != Dout:
        weight = jnp.pad(weight, ((0, 0), (0, Dout_p - Dout)))
    if Np != N:
        # NOTE: materializes padded copies; for a fixed graph the caller should
        # pre-pad (and bf16-cache) adj once instead of per call.
        inputs = jnp.pad(inputs, ((0, Np - N), (0, 0)))
        adj = jnp.pad(adj, ((0, Np - N), (0, Np - N)))

    adj_bytes = adj.dtype.itemsize
    x_bytes = inputs.dtype.itemsize
    w_bytes = weight.dtype.itemsize

    # ---------------- pass 1: xw = inputs @ weight  (bf16 out) ---------------
    tile_mp = _pick_tile(Np, (1024, 512, 256, 128, 64, 32, 16, 8),
                         prefer_two_blocks=True)

    def proj_fp(tm):
        return (2 * tm * Din * x_bytes          # input tile, double buffered
                + 2 * Din * Dout_p * w_bytes    # resident weight (conservative)
                + 2 * tm * Dout_p * 2)          # bf16 output tile

    while proj_fp(tile_mp) > _VMEM_BUDGET and tile_mp > 8:
        tile_mp //= 2
    # TODO(synk): if Din is so large that the resident weight alone exceeds the
    # budget (e.g. Din ~ 16k on v7x), k-tile the Din contraction as well.

    xw = pl.pallas_call(
        proj_kernel,
        out_shape=jax.ShapeDtypeStruct((Np, Dout_p), jnp.bfloat16),
        grid_spec=pltpu.PrefetchScalarGridSpec(
            num_scalar_prefetch=0,
            grid=(Np // tile_mp,),
            in_specs=[
                pl.BlockSpec((tile_mp, Din), lambda i: (i, 0)),   # input rows
                pl.BlockSpec((Din, Dout_p), lambda i: (0, 0)),    # weight
            ],
            out_specs=pl.BlockSpec((tile_mp, Dout_p), lambda i: (i, 0)),
        ),
        compiler_params=pltpu.CompilerParams(
            dimension_semantics=("parallel",),
            vmem_limit_bytes=_vmem_limit(proj_fp(tile_mp)),
        ),
    )(inputs, weight)

    # ---------------- pass 2: out = relu(adj @ xw) ---------------------------
    tile_m = _pick_tile(Np, (1024, 512, 256, 128, 64, 32, 16, 8),
                        prefer_two_blocks=True)
    tile_k = _pick_tile(Np, (2048, 1024, 512, 256, 128))

    def agg_fp(tm, tk, resident):
        return (2 * tm * tk * adj_bytes                         # adj stream
                + 2 * tm * Dout_p * 4                           # f32 out tile
                + 2 * (Np if resident else tk) * Dout_p * 2)    # bf16 xw

    xw_resident = agg_fp(tile_m, tile_k, True) <= _VMEM_BUDGET
    while agg_fp(tile_m, tile_k, xw_resident) > _VMEM_BUDGET and tile_k > 128:
        tile_k //= 2
    while agg_fp(tile_m, tile_k, xw_resident) > _VMEM_BUDGET and tile_m > 8:
        tile_m //= 2

    if xw_resident:
        # Constant block index -> xw DMA'd into VMEM once, reused by every tile.
        xw_spec = pl.BlockSpec((Np, Dout_p), lambda i, k: (0, 0))
    else:
        xw_spec = pl.BlockSpec((tile_k, Dout_p), lambda i, k: (k, 0))

    # TODO(synk): if profiling shows exposed DMA at k-step boundaries, add
    # pipeline_mode=pl.Buffered(3) on the adj BlockSpec.
    out = pl.pallas_call(
        make_agg_kernel(tile_k, xw_resident),
        out_shape=jax.ShapeDtypeStruct((Np, Dout_p), jnp.float32),
        grid_spec=pltpu.PrefetchScalarGridSpec(
            num_scalar_prefetch=0,
            grid=(Np // tile_m, Np // tile_k),
            in_specs=[
                pl.BlockSpec((tile_m, tile_k), lambda i, k: (i, k)),  # adj tile
                xw_spec,
            ],
            out_specs=pl.BlockSpec((tile_m, Dout_p), lambda i, k: (i, 0)),
        ),
        compiler_params=pltpu.CompilerParams(
            dimension_semantics=("parallel", "arbitrary"),
            vmem_limit_bytes=_vmem_limit(agg_fp(tile_m, tile_k, xw_resident)),
        ),
    )(adj, xw)

    return out[:N, :Dout]


def glorot_init(key, input_dim, output_dim):
    init_range = np.sqrt(6.0 / (input_dim + output_dim))
    return jax.random.uniform(
        key, (input_dim, output_dim), jnp.float32,
        minval=-init_range, maxval=init_range,
    )


# ------------------------------ demo / check --------------------------------


if __name__ == "__main__":
    # Small synthetic graph: N nodes, Din input features, Dout output features.
    N, Din, Dout = 128, 64, 128

    key = jax.random.PRNGKey(0)
    k_w, k_x, k_a = jax.random.split(key, 3)

    weight = glorot_init(k_w, Din, Dout)                       # [Din, Dout]
    inputs = jax.random.normal(k_x, (N, Din), jnp.float32)     # [N, Din]
    # Dense normalized adjacency (the module only needs a dense [N, N] matmul).
    adj_raw = (jax.random.uniform(k_a, (N, N)) < 0.1).astype(jnp.float32)
    adj = adj_raw + adj_raw.T + jnp.eye(N, dtype=jnp.float32)
    adj = adj / jnp.maximum(adj.sum(axis=1, keepdims=True), 1.0)

    out = graph_conv_sparse(inputs, weight, adj)
    out = jax.block_until_ready(out)

    # Pure-JAX references.
    ref_f32 = jnp.maximum(adj @ (inputs @ weight), 0.0)
    # bf16-emulated reference (matches the kernel's streaming precision).
    xw_bf16 = jnp.dot(inputs.astype(jnp.bfloat16), weight.astype(jnp.bfloat16),
                      preferred_element_type=jnp.float32).astype(jnp.bfloat16)
    ref_bf16 = jnp.maximum(
        jnp.dot(adj.astype(jnp.bfloat16), xw_bf16,
                preferred_element_type=jnp.float32), 0.0)

    np.testing.assert_allclose(np.asarray(out), np.asarray(ref_bf16),
                               rtol=1e-2, atol=1e-2)
    np.testing.assert_allclose(np.asarray(out), np.asarray(ref_f32),
                               rtol=3e-2, atol=3e-2)

    print("KERNEL_OK")
</pallas_src>

<mosaic_0001>
module attributes {stable_mosaic.version = 11 : i64} {
  func.func @proj_kernel(%arg0: i32, %arg1: memref<64x64xf32, #tpu.memory_space<vmem>>, %arg2: memref<64x128xf32, #tpu.memory_space<vmem>>, %arg3: memref<64x128xbf16, #tpu.memory_space<vmem>>) attributes {dimension_semantics = [#tpu.dimension_semantics<parallel>], iteration_bounds = array<i64: 2>, scalar_prefetch = 0 : i64, scratch_operands = 0 : i64, tpu.core_type = #tpu.core_type<tc>, window_params = [{transform_indices = @transform_0, window_bounds = array<i64: 64, 64>}, {pipeline_mode = #tpu.pipeline_mode<synchronous>, transform_indices = @transform_1, window_bounds = array<i64: 64, 128>}, {transform_indices = @transform_2, window_bounds = array<i64: 64, 128>}]} {
    %c0 = arith.constant 0 : index
    %c0_0 = arith.constant 0 : index
    %0 = vector.load %arg1[%c0, %c0_0] : memref<64x64xf32, #tpu.memory_space<vmem>>, vector<64x64xf32>
    %1 = arith.truncf %0 : vector<64x64xf32> to vector<64x64xbf16>
    %c0_1 = arith.constant 0 : index
    %c0_2 = arith.constant 0 : index
    %2 = vector.load %arg2[%c0_1, %c0_2] : memref<64x128xf32, #tpu.memory_space<vmem>>, vector<64x128xf32>
    %3 = arith.truncf %2 : vector<64x128xf32> to vector<64x128xbf16>
    %cst = arith.constant dense<0.000000e+00> : vector<64x128xf32>
    %4 = tpu.matmul %1, %3, %cst {dimension_numbers = #tpu.dot_dimension_numbers<[1], [0], [0], [1], [0, 0, 1, 1], [], []>} : vector<64x64xbf16>, vector<64x128xbf16>, vector<64x128xf32> -> vector<64x128xf32>
    %5 = arith.truncf %4 : vector<64x128xf32> to vector<64x128xbf16>
    %c0_3 = arith.constant 0 : index
    %c0_4 = arith.constant 0 : index
    %6 = vector.load %arg3[%c0_3, %c0_4] : memref<64x128xbf16, #tpu.memory_space<vmem>>, vector<64x128xbf16>
    tpu.vector_store %arg3[%c0_3, %c0_4], %5 {strides = array<i32>} : memref<64x128xbf16, #tpu.memory_space<vmem>>, vector<64x128xbf16>,
    return
  }
  func.func @transform_0(%arg0: i32) -> (i32, i32) {
    %c0_i32 = arith.constant 0 : i32
    %c0_i32_0 = arith.constant 0 : i32
    return %arg0, %c0_i32 : i32, i32
  }
  func.func @transform_1(%arg0: i32) -> (i32, i32) {
    %c0_i32 = arith.constant 0 : i32
    %c0_i32_0 = arith.constant 0 : i32
    %c0_i32_1 = arith.constant 0 : i32
    return %c0_i32, %c0_i32_0 : i32, i32
  }
  func.func @transform_2(%arg0: i32) -> (i32, i32) {
    %c0_i32 = arith.constant 0 : i32
    %c0_i32_0 = arith.constant 0 : i32
    return %arg0, %c0_i32 : i32, i32
  }
}

</mosaic_0001>

<bundles_post_ra>
// kernel: tpu_custom_call.1
= control target key start
LH: loop header
LB: loop body
LE: loop exit
PB: predicated region body
PF: predicated region fallthrough
CT: control target
= control target key end

     0   :  { %7 = vsyncpa [#allocation3], 0  ;;  %s705_s0 = inlined_call_operand.vmem [shape: f32[128,64], index: 0, kind: input, shape index: {}]   ;;  %s706_s1 = inlined_call_operand.vmem [shape: f32[64,128], index: 1, kind: input, shape index: {}]   ;;  %s707_s2 = inlined_call_operand.hbm [shape: bf16[128,128], index: 2, kind: output, shape index: {}]  }
   0x1   :  { %9 = vsyncpa [#allocation3 + $0x1], 0  ;;  %s575_s9 = smov 0   ;;  %s577_s10 = smov 0  }
   0x2   :  { %s579_s11 = smov 0   ;;  %s581_s12 = smov 0  }
   0x3 LB: > { %s596_s13 = sadd.s32 4294967295, %s555_s12   ;;  %s364_s14 = sadd.s32 4294967294, %s555_s12   ;;  %s555_s12 = sphi %s581_s12, %s713_s12   ;;  %s551_s11 = sphi %s579_s11, %s712_s11   ;;  %s547_s10 = sphi %s577_s10, %s711_s10   ;;  %s543_s9 = sphi %s575_s9, %s710_s9  }
   0x4   : > { %s600_s15 = sadd.s32 1, %s555_s12   ;;  %s69_s16 = sadd.s32 1, %s551_s11 }
   0x5   : > { %s66_s17 = ssub.s32 %s555_s12, %s600_s15  ;;  %p79_p0 = scmp.ne.s32.totalorder %s551_s11, %s547_s10 }
   0x6   : > { %p67_p1 = scmp.eq.s32.totalorder %s66_s17, 0  ;;  %p80_p2 = scmp.eq.s32.totalorder %s596_s13, 1 }
   0x7   : > { %p85_p3 = scmp.ne.s32.totalorder %s547_s10, %s543_s9  ;;  %p86_p4 = scmp.eq.s32.totalorder %s364_s14, 1 }
   0x8   : > { %s611_s18 = scalar_select %p67_p1, %s551_s11, %s69_s16  }
   0x9   : > { %p613_p5 = por %p80_p2, %p79_p0  ;;  %p617_p6 = por %p86_p4, %p85_p3 }
   0xa   : > { %p367_p7 = scmp.ge.s32.totalorder %s555_s12, 1  ;;  %p116_p8 = scmp.lt.s32.totalorder %s555_s12, 3 }
   0xc   : > { %p117_p9 = pnand %p367_p7, %p116_p8 }
   0xd   : > { %v158_v0 = vld [vmem:[%s706_s1] sm:$0xff] (!%p117_p9)  ;;  %v159_v1 = vld [vmem:[%s706_s1 + $0x8] sm:$0xff] (!%p117_p9)  ;;  %v160_v2 = vld [vmem:[%s706_s1 + $0x10] sm:$0xff] (!%p117_p9)  ;;  %s369_s27 = sshll.u32 (!%p117_p9), %s596_s13, 3  ;;  %vm170_vm0 = vcmask (!%p117_p9), 523264   ;;  %s135_s23 = sand.u32 (!%p117_p9), 1, %s547_s10  }
   0xe   : > { %120 = sbr.rel (%p117_p9) target bundleno = 264 (0x108), region = 28  ;;  %v166_v3 = vpack.c.bf16 (!%p117_p9), %v159_v1, %v158_v0  ;;  %v161_v4 = vld [vmem:[%s706_s1 + $0x18] sm:$0xff] (!%p117_p9)  ;;  %p139_p10 = scmp.lt.s32.totalorder (!%p117_p9), %s369_s27, 15  ;;  %v162_v6 = vld [vmem:[%s706_s1 + $0x20] sm:$0xff] (!%p117_p9)  ;;  %v163_v7 = vld [vmem:[%s706_s1 + $0x28] sm:$0xff] (!%p117_p9) }
   0xf   : > { %v167_v5 = vpack.c.bf16 (!%p117_p9), %v161_v4, %v160_v2  ;;  %v168_v8 = vpack.c.bf16 (!%p117_p9), %v163_v7, %v162_v6  ;;  %v164_v9 = vld [vmem:[%s706_s1 + $0x30] sm:$0xff] (!%p117_p9)  ;;  %v165_v10 = vld [vmem:[%s706_s1 + $0x38] sm:$0xff] (!%p117_p9)  ;;  %s368_s24 = sshll.u32 (!%p117_p9), %s135_s23, 5  ;;  %s557_s4 = smov (!%p117_p9), [#allocation2]  }
  0x10   : > { %428 = vmatprep.subr.bf16.mxu0 (!%p117_p9), %v166_v3  ;;  %444 = vmatprep.subr.bf16.mxu1 (!%p117_p9), %v166_v3  ;;  %v169_v16 = vpack.c.bf16 (!%p117_p9), %v165_v10, %v164_v9  ;;  %s137_s25 = scalar_lea.vmem (!%p117_p9), [#allocation2], %s368_s24  ;;  %s497_s5 = sshll.u32 (!%p117_p9), %s557_s4, 4  ;;  %s498_s5 = int_to_ptr.vmem [resolvable:$false] %s497_s5 }
  0x11   : > { %429 = vmatpush3.bf16.msra.mxu0 (!%p117_p9), %v166_v3  ;;  %448 = vmatpush3.bf16.msra.mxu1 (!%p117_p9), %v166_v3  ;;  %s302_s26 = sshll.u32 (!%p117_p9), %s137_s25, 4  ;;  %s657_s26 = int_to_ptr.vmem [resolvable:$true] %s302_s26 }
  0x12   : > { %430 = vmatprep.subr.bf16.mxu0 (!%p117_p9), %v167_v5  ;;  %445 = vmatprep.subr.bf16.mxu1 (!%p117_p9), %v167_v5  ;;  %s493_s3 = scalar_lea.vmem (!%p117_p9), %s657_s26, 512  ;;  %p500_p0 = scmp.lt.s32.totalorder (!%p117_p9), %s657_s26, %s498_s5 }
  0x13   : > { %p494_p11 = scmp.ne.s32.totalorder (!%p117_p9), %s657_s26, %s493_s3 }
  0x15   : > { %s715_s27 = smov (!%p139_p10, %s369_s27), 15  ;;  %431 = vmatpush3.bf16.msra.mxu0 %v167_v5  ;;  %449 = vmatpush3.bf16.msra.mxu1 %v167_v5  ;;  %p495_p12 = pnand %p494_p11, %p613_p5 }
  0x16   : > { %s370_s6 = sshll.u32 %s715_s27, 3  ;;  %432 = vmatprep.subr.bf16.mxu0 %v168_v8  ;;  %446 = vmatprep.subr.bf16.mxu1 %v168_v8  ;;  %s396_s27 = sshll.u32 %s596_s13, 9 }
  0x17   : > { %s142_s22 = scalar_lea.vmem %s705_s0, %s370_s6  ;;  %s662_s30 = scalar_lea.hbm %s707_s2, %s396_s27 }
  0x18   : > { %v146_v11 = vld [vmem:[%s142_s22] sm:$0xff]  ;;  %v147_v12 = vld [vmem:[%s142_s22 + $0x8] sm:$0xff]  ;;  %v148_v18 = vld [vmem:[%s142_s22 + $0x10] sm:$0xff]  ;;  %s664_s13 = scalar_lea.sflag [#allocation3], %s135_s23  ;;  %p496_p13 = pneg %p495_p12 }
  0x19   : > { %v150_v13 = vld [vmem:[%s142_s22 + $0x20] sm:$0xff]  ;;  %v154_v14 = vpack.c.bf16 %v147_v12, %v146_v11  ;;  %v151_v15 = vld [vmem:[%s142_s22 + $0x28] sm:$0xff]  ;;  %433 = vmatpush3.bf16.msra.mxu0 %v168_v8  ;;  %450 = vmatpush3.bf16.msra.mxu1 %v168_v8  ;;  %v149_v19 = vld [vmem:[%s142_s22 + $0x18] sm:$0xff]  ;;  %s499_s6 = scalar_lea.vmem %s498_s5, 1024 }
  0x1a   : > { %v156_v17 = vpack.c.bf16 %v151_v15, %v150_v13  ;;  %v152_v20 = vld [vmem:[%s142_s22 + $0x30] sm:$0xff]  ;;  %v153_v21 = vld [vmem:[%s142_s22 + $0x38] sm:$0xff]  ;;  %434 = vmatprep.subr.bf16.mxu0 %v169_v16  ;;  %447 = vmatprep.subr.bf16.mxu1 %v169_v16  ;;  %v155_v22 = vpack.c.bf16 %v149_v19, %v148_v18  ;;  %p501_p1 = scmp.lt.s32.totalorder %s499_s6, %s493_s3 }
  0x1b   : > { %436 = vmatprep.mubr.msk.bf16.mxu0 %vm170_vm0, %v154_v14  ;;  %v157_v23 = vpack.c.bf16 %v153_v21, %v152_v20 }
  0x1c   : > { %440 = vmatprep.mubr.msk.bf16.mxu1 %vm170_vm0, %v156_v17  ;;  %p502_p2 = por %p501_p1, %p500_p0 }
  0x1d   : > { %435 = vmatpush3.bf16.msra.mxu0 %v169_v16  ;;  %451 = vmatpush3.bf16.msra.mxu1 %v169_v16 }
  0x1e   : > { %p503_p3 = pnand %p502_p2, %p496_p13 }
  0x20   : > { %437 = vmatmul.mubr.msk.bf16.vlgmr.msra.gmra.mrb[0].mxu0 %vm170_vm0, %v155_v22  ;;  %441 = vmatmul.mubr.msk.bf16.vlgmr.msra.gmra.mrb[0].mxu1 %vm170_vm0, %v157_v23 }
  0xf3   : > { %v438_v24 = vpop.f32.mrb[0].mxu0  ;;  %v442_v25 = vpop.f32.mrb[0].mxu1 }
  0xf4   : > { %v217_v26 = vpop.f32.mrb[1].mxu0  ;;  %v233_v27 = vpop.f32.mrb[1].mxu1 }
  0xf5   : > { %v439_v28 = vpop.f32.mrb[2].mxu0  ;;  %v443_v29 = vpop.f32.mrb[2].mxu1 }
  0xf6   : > { %v405_v30 = vpack.c.bf16 %v439_v28, %v438_v24  ;;  %v415_v31 = vpack.c.bf16 %v443_v29, %v442_v25  ;;  %v220_v32 = vpop.f32.mrb[3].mxu0  ;;  %v236_v33 = vpop.f32.mrb[3].mxu1 }
  0xf7   : > { %v400_v34 = vpack.c.bf16 %v220_v32, %v217_v26  ;;  %v410_v35 = vpack.c.bf16 %v236_v33, %v233_v27 }
  0xf8   : > { %417 = vst [vmem:[%s137_s25 + $0x8] sm:$0xff] %v405_v30   ;;  %419 = vst [vmem:[%s137_s25 + $0x18] sm:$0xff] %v415_v31  }
  0xf9   : > { %401 = vst [vmem:[%s137_s25] sm:$0xff] %v400_v34   ;;  %418 = vst [vmem:[%s137_s25 + $0x10] sm:$0xff] %v410_v35  }
  0xfa   : > { %506 = shalt.err (!%p503_p3)
}
  0xfb   : > { %s507_s7 = scalar_lea.hbm %s662_s30, 512  ;;  %s511_s16 = scalar_lea.hbm %s707_s2, 1024 }
  0xfc   : > { %p508_p4 = scmp.ne.s32.totalorder %s662_s30, %s507_s7  ;;  %p512_p9 = scmp.lt.u32.totalorder %s662_s30, %s707_s2 }
  0xfd   : > { %p513_p10 = scmp.lt.u32.totalorder %s511_s16, %s507_s7  ;;  %p515_p12 = scmp.lt.u32.totalorder %s507_s7, %s662_s30 }
  0xfe   : > { %p509_p7 = pnand %p508_p4, %p613_p5 }
  0xff   : > { %p514_p11 = por %p513_p10, %p512_p9 }
 0x100   : > { %p510_p8 = pneg %p509_p7 }
 0x101   : > { %p516_p13 = por %p515_p12, %p514_p11 }
 0x103   : > { %p517_p0 = pnand %p516_p13, %p510_p8 }
 0x105   : > { %520 = shalt.err (!%p517_p0)
}
 0x106   : > { %s558_s22 = smov 64   ;;  %s559_s23 = smov 4  }
 0x107   : > { %452 = dma.vmem_to_hbm [thread:$0]  (%p613_p5), %s657_s26, 512, %s662_s30, %s664_s13, %s558_s22, %s558_s22, %s559_s23  }
 0x108 PF: > { %p458_p1 = scmp.ge.s32.totalorder %s555_s12, 2  ;;  %s317_s24 = sand.u32 1, %s543_s9  }
 0x109   : > { %s318_s25 = scalar_lea.sflag [#allocation3], %s317_s24 }
 0x10a   : > { %p455_p2 = pnand %p458_p1, %p617_p6 }
 0x10c   : > { %538 = dma.done.wait (!%p455_p2), %s318_s25, 512  }
 0x10d   : > { %540 = vsyncadd (!%p455_p2), %s318_s25, 4294966784  ;;  %p12_p3 = scmp.ge.s32.totalorder %s600_s15, 4   ;;  %s710_s9 = smov %s547_s10 }
 0x10e   : > { %s711_s10 = smov %s551_s11  ;;  %s712_s11 = smov %s611_s18 }
 0x10f   : > { %s713_s12 = smov %s600_s15  ;;  %14 = sbr.rel (!%p12_p3) target bundleno = 3 (0x3), region = 63 }
 0x116   :  { %323 = vsyncpa [#allocation3], 1 }
 0x117   :  { %325 = vsyncpa [#allocation3 + $0x1], 1 }

</bundles_post_ra>
